<compile_context>
chip_gen: v7x
topology: tpu7x:2x2x1
jax: 0.10.0
libtpu: 0.0.40
codegen_flags: <defaults>
</compile_context>

<pallas_src>
import functools

import jax
import jax.numpy as jnp
from jax.experimental import pallas as pl
from jax.experimental.pallas import tpu as pltpu


def _round_up(x: int, m: int) -> int:
    return (x + m - 1) // m * m


def _linear_relu_kernel(x_ref, w_ref, o_ref, acc_ref):
    # x_ref:  (bm, bk) input tile
    # w_ref:  (bn, bk) weight tile in PyTorch [out, in] layout (no transpose)
    # o_ref:  (bm, bn) output tile
    # acc_ref:(bm, bn) f32 accumulator, resident across the k axis
    @pl.when(pl.program_id(2) == 0)
    def _init():
        acc_ref[...] = jnp.zeros_like(acc_ref)

    acc_ref[...] += jax.lax.dot_general(
        x_ref[...],
        w_ref[...],
        dimension_numbers=(((1,), (1,)), ((), ())),  # contract K with K
        preferred_element_type=jnp.float32,
    )

    @pl.when(pl.program_id(2) == pl.num_programs(2) - 1)
    def _finalize():
        # ReLU on the f32 accumulator, then cast to the output dtype.
        o_ref[...] = jnp.maximum(acc_ref[...], 0.0).astype(o_ref.dtype)


@functools.partial(jax.jit, static_argnames=("block_m", "block_n", "block_k"))
def structure_layer_forward(x, weight, *, block_m=512, block_n=512, block_k=512):
    """ReLU(x @ weight.T).

    x:      [..., K]   (e.g. [batch, seq, hidden])
    weight: [N, K]     (PyTorch nn.Linear convention: [out_features, in_features])
    """
    *lead, k = x.shape
    n = weight.shape[0]
    assert weight.shape == (n, k)

    x2d = x.reshape(-1, k)
    m = x2d.shape[0]

    # Tile sizes: multiples of 8 (sublane) / 128 (lane), capped by the
    # (padded) problem size so small problems run as a single grid step.
    bm = min(block_m, _round_up(m, 8))
    bn = min(block_n, _round_up(n, 128))
    bk = min(block_k, _round_up(k, 128))

    m_pad = _round_up(m, bm)
    n_pad = _round_up(n, bn)
    k_pad = _round_up(k, bk)

    if (m_pad, k_pad) != (m, k):
        x2d = jnp.pad(x2d, ((0, m_pad - m), (0, k_pad - k)))
    w_p = weight
    if (n_pad, k_pad) != (n, k):
        w_p = jnp.pad(weight, ((0, n_pad - n), (0, k_pad - k)))

    grid = (m_pad // bm, n_pad // bn, k_pad // bk)

    out2d = pl.pallas_call(
        _linear_relu_kernel,
        out_shape=jax.ShapeDtypeStruct((m_pad, n_pad), x.dtype),
        grid_spec=pltpu.PrefetchScalarGridSpec(
            num_scalar_prefetch=0,
            grid=grid,
            in_specs=[
                pl.BlockSpec((bm, bk), lambda i, j, kk: (i, kk)),   # x tile
                pl.BlockSpec((bn, bk), lambda i, j, kk: (j, kk)),   # W tile ([out, in])
            ],
            out_specs=pl.BlockSpec((bm, bn), lambda i, j, kk: (i, j)),
            scratch_shapes=[pltpu.VMEM((bm, bn), jnp.float32)],
        ),
        compiler_params=pltpu.CompilerParams(
            dimension_semantics=("parallel", "parallel", "arbitrary"),
        ),
    )(x2d, w_p)

    out2d = out2d[:m, :n]
    return out2d.reshape(*lead, n)


if __name__ == "__main__":
    # Small shapes implied by the module: batch=2, seq=8, hidden=32
    batch, seq, hidden = 2, 8, 32

    key = jax.random.PRNGKey(0)
    kx, kw = jax.random.split(key)

    x = jax.random.normal(kx, (batch, seq, hidden), dtype=jnp.float32)
    # PyTorch nn.Linear stores weight as [out_features, in_features];
    # scale roughly like kaiming-uniform.
    bound = 1.0 / (hidden ** 0.5)
    weight = jax.random.uniform(
        kw, (hidden, hidden), minval=-bound, maxval=bound, dtype=jnp.float32
    )

    out = structure_layer_forward(x, weight)
    jax.block_until_ready(out)

    # Reference check against plain JAX semantics of Linear(no bias) + ReLU
    ref = jnp.maximum(jnp.einsum("bsh,oh->bso", x, weight), 0.0)
    assert out.shape == (batch, seq, hidden)
    assert jnp.allclose(out, ref, atol=1e-5, rtol=1e-5)

    print("KERNEL_OK")
</pallas_src>

<mosaic_0001>
module attributes {stable_mosaic.version = 11 : i64} {
  func.func @_linear_relu_kernel(%arg0: i32, %arg1: i32, %arg2: i32, %arg3: memref<16x128xf32, #tpu.memory_space<vmem>>, %arg4: memref<128x128xf32, #tpu.memory_space<vmem>>, %arg5: memref<16x128xf32, #tpu.memory_space<vmem>>, %arg6: memref<16x128xf32, #tpu.memory_space<vmem>>) attributes {dimension_semantics = [#tpu.dimension_semantics<parallel>, #tpu.dimension_semantics<parallel>, #tpu.dimension_semantics<arbitrary>], iteration_bounds = array<i64: 1, 1, 1>, scalar_prefetch = 0 : i64, scratch_operands = 1 : i64, tpu.core_type = #tpu.core_type<tc>, window_params = [{transform_indices = @transform_0, window_bounds = array<i64: 16, 128>}, {transform_indices = @transform_1, window_bounds = array<i64: 128, 128>}, {transform_indices = @transform_2, window_bounds = array<i64: 16, 128>}]} {
    %c0_i32 = arith.constant 0 : i32
    %0 = arith.cmpi eq, %arg2, %c0_i32 : i32
    %1 = arith.extui %0 : i1 to i32
    %c0_i32_0 = arith.constant 0 : i32
    %2 = arith.cmpi ne, %1, %c0_i32_0 : i32
    scf.if %2 {
      %cst_10 = arith.constant 0.000000e+00 : f32
      %12 = vector.broadcast %cst_10 : f32 to vector<16x128xf32>
      %c0_11 = arith.constant 0 : index
      %c0_12 = arith.constant 0 : index
      %13 = vector.load %arg6[%c0_11, %c0_12] : memref<16x128xf32, #tpu.memory_space<vmem>>, vector<16x128xf32>
      tpu.vector_store %arg6[%c0_11, %c0_12], %12 {strides = array<i32>} : memref<16x128xf32, #tpu.memory_space<vmem>>, vector<16x128xf32>,
    } else {
    }
    %c0 = arith.constant 0 : index
    %c0_1 = arith.constant 0 : index
    %3 = vector.load %arg6[%c0, %c0_1] : memref<16x128xf32, #tpu.memory_space<vmem>>, vector<16x128xf32>
    %c0_2 = arith.constant 0 : index
    %c0_3 = arith.constant 0 : index
    %4 = vector.load %arg3[%c0_2, %c0_3] : memref<16x128xf32, #tpu.memory_space<vmem>>, vector<16x128xf32>
    %c0_4 = arith.constant 0 : index
    %c0_5 = arith.constant 0 : index
    %5 = vector.load %arg4[%c0_4, %c0_5] : memref<128x128xf32, #tpu.memory_space<vmem>>, vector<128x128xf32>
    %cst = arith.constant dense<0.000000e+00> : vector<16x128xf32>
    %6 = tpu.matmul %4, %5, %cst {dimension_numbers = #tpu.dot_dimension_numbers<[1], [1], [0], [0], [0, 0, 1, 0], [], []>} : vector<16x128xf32>, vector<128x128xf32>, vector<16x128xf32> -> vector<16x128xf32>
    %7 = arith.addf %3, %6 : vector<16x128xf32>
    %c0_6 = arith.constant 0 : index
    %c0_7 = arith.constant 0 : index
    %8 = vector.load %arg6[%c0_6, %c0_7] : memref<16x128xf32, #tpu.memory_space<vmem>>, vector<16x128xf32>
    tpu.vector_store %arg6[%c0_6, %c0_7], %7 {strides = array<i32>} : memref<16x128xf32, #tpu.memory_space<vmem>>, vector<16x128xf32>,
    %c0_i32_8 = arith.constant 0 : i32
    %9 = arith.cmpi eq, %arg2, %c0_i32_8 : i32
    %10 = arith.extui %9 : i1 to i32
    %c0_i32_9 = arith.constant 0 : i32
    %11 = arith.cmpi ne, %10, %c0_i32_9 : i32
    scf.if %11 {
      %c0_10 = arith.constant 0 : index
      %c0_11 = arith.constant 0 : index
      %12 = vector.load %arg6[%c0_10, %c0_11] : memref<16x128xf32, #tpu.memory_space<vmem>>, vector<16x128xf32>
      %cst_12 = arith.constant 0.000000e+00 : f32
      %13 = vector.broadcast %cst_12 : f32 to vector<16x128xf32>
      %14 = arith.maximumf %12, %13 : vector<16x128xf32>
      %c0_13 = arith.constant 0 : index
      %c0_14 = arith.constant 0 : index
      %15 = vector.load %arg5[%c0_13, %c0_14] : memref<16x128xf32, #tpu.memory_space<vmem>>, vector<16x128xf32>
      tpu.vector_store %arg5[%c0_13, %c0_14], %14 {strides = array<i32>} : memref<16x128xf32, #tpu.memory_space<vmem>>, vector<16x128xf32>,
    } else {
    }
    return
  }
  func.func @transform_0(%arg0: i32, %arg1: i32, %arg2: i32) -> (i32, i32) {
    %c0_i32 = arith.constant 0 : i32
    return %arg0, %arg2 : i32, i32
  }
  func.func @transform_1(%arg0: i32, %arg1: i32, %arg2: i32) -> (i32, i32) {
    %c0_i32 = arith.constant 0 : i32
    return %arg1, %arg2 : i32, i32
  }
  func.func @transform_2(%arg0: i32, %arg1: i32, %arg2: i32) -> (i32, i32) {
    %c0_i32 = arith.constant 0 : i32
    return %arg0, %arg1 : i32, i32
  }
}

</mosaic_0001>

<bundles_post_ra>
// kernel: structure_layer_forward.1
= control target key start
LH: loop header
LB: loop body
LE: loop exit
PB: predicated region body
PF: predicated region fallthrough
CT: control target
= control target key end

     0   :  { %s289_s1 = inlined_call_operand.vmem [shape: f32[128,128], index: 1, kind: input, shape index: {}]   ;;  %s290_s0 = inlined_call_operand.vmem [shape: f32[16,128], index: 0, kind: input, shape index: {}]   ;;  %s291_s2 = inlined_call_operand.vmem [shape: f32[16,128], index: 2, kind: output, shape index: {}]  }
   0x1   :  { %v21_v0 = vld [vmem:[%s289_s1] sm:$0xff]  ;;  %v22_v1 = vld [vmem:[%s289_s1 + $0x8] sm:$0xff]  ;;  %v23_v2 = vld [vmem:[%s289_s1 + $0x10] sm:$0xff] }
   0x2   :  { %v182_v3 = vpack.c.bf16 %v22_v1, %v21_v0  ;;  %v24_v4 = vld [vmem:[%s289_s1 + $0x18] sm:$0xff]  ;;  %v19_v6 = vld [vmem:[%s290_s0] sm:$0xff]  ;;  %v26_v8 = vld [vmem:[%s289_s1 + $0x28] sm:$0xff] }
   0x3   :  { %v186_v5 = vpack.c.bf16 %v24_v4, %v23_v2  ;;  %v25_v7 = vld [vmem:[%s289_s1 + $0x20] sm:$0xff]  ;;  %179 = vmatprep.mubr.f32.mxu0 %v19_v6  ;;  %v27_v10 = vld [vmem:[%s289_s1 + $0x30] sm:$0xff]  ;;  %v28_v11 = vld [vmem:[%s289_s1 + $0x38] sm:$0xff] }
   0x4   :  { %183 = vmatprep.subr.bf16.mxu0 %v182_v3  ;;  %v190_v9 = vpack.c.bf16 %v26_v8, %v25_v7  ;;  %v194_v12 = vpack.c.bf16 %v28_v11, %v27_v10  ;;  %v29_v13 = vld [vmem:[%s289_s1 + $0x40] sm:$0xff]  ;;  %v30_v14 = vld [vmem:[%s289_s1 + $0x48] sm:$0xff]  ;;  %v31_v16 = vld [vmem:[%s289_s1 + $0x50] sm:$0xff] }
   0x5   :  { %185 = vmatpush3.bf16.xpose.msra.mxu0 %v182_v3  ;;  %v198_v15 = vpack.c.bf16 %v30_v14, %v29_v13  ;;  %v32_v17 = vld [vmem:[%s289_s1 + $0x58] sm:$0xff]  ;;  %v33_v19 = vld [vmem:[%s289_s1 + $0x60] sm:$0xff]  ;;  %v34_v20 = vld [vmem:[%s289_s1 + $0x68] sm:$0xff] }
   0x6   :  { %187 = vmatprep.subr.bf16.mxu0 %v186_v5  ;;  %v202_v18 = vpack.c.bf16 %v32_v17, %v31_v16  ;;  %v206_v21 = vpack.c.bf16 %v34_v20, %v33_v19  ;;  %v35_v22 = vld [vmem:[%s289_s1 + $0x70] sm:$0xff]  ;;  %v36_v23 = vld [vmem:[%s289_s1 + $0x78] sm:$0xff]  ;;  %v20_v25 = vld [vmem:[%s290_s0 + $0x8] sm:$0xff] }
   0x7   :  { %v210_v24 = vpack.c.bf16 %v36_v23, %v35_v22 }
   0xd   :  { %189 = vmatpush3.bf16.xpose.msra.mxu0 %v186_v5 }
   0xe   :  { %191 = vmatprep.subr.bf16.mxu0 %v190_v9 }
  0x15   :  { %193 = vmatpush3.bf16.xpose.msra.mxu0 %v190_v9 }
  0x16   :  { %195 = vmatprep.subr.bf16.mxu0 %v194_v12 }
  0x1d   :  { %197 = vmatpush3.bf16.xpose.msra.mxu0 %v194_v12 }
  0x1e   :  { %199 = vmatprep.subr.bf16.mxu0 %v198_v15 }
  0x25   :  { %201 = vmatpush3.bf16.xpose.msra.mxu0 %v198_v15 }
  0x26   :  { %203 = vmatprep.subr.bf16.mxu0 %v202_v18 }
  0x2d   :  { %205 = vmatpush3.bf16.xpose.msra.mxu0 %v202_v18 }
  0x2e   :  { %207 = vmatprep.subr.bf16.mxu0 %v206_v21 }
  0x35   :  { %209 = vmatpush3.bf16.xpose.msra.mxu0 %v206_v21 }
  0x36   :  { %211 = vmatprep.subr.bf16.mxu0 %v210_v24 }
  0x3d   :  { %213 = vmatpush3.bf16.xpose.msra.mxu0 %v210_v24 }
  0x44   :  { %180 = vmatmul.mubr.f32.vlgmr.msra.gmra.mrb[0].mxu0 %v20_v25 }
 0x117   :  { %v181_v26 = vpop.f32.mrb[0].mxu0 }
 0x118   :  { %v122_v27 = vmax.f32 %v181_v26, 0.0  ;;  %v103_v28 = vpop.f32.mrb[1].mxu0 }
 0x119   :  { %v121_v29 = vmax.f32 %v103_v28, 0.0 }
 0x11a   :  { %124 = vst [vmem:[%s291_s2 + $0x8] sm:$0xff] %v122_v27 }
 0x11b   :  { %123 = vst [vmem:[%s291_s2] sm:$0xff] %v121_v29 }

</bundles_post_ra>
